<compile_context>
chip_gen: v5e
topology: v5e:2x2
jax: 0.10.0
libtpu: 0.0.40
codegen_flags: <defaults>
</compile_context>

<pallas_src>
import jax
import jax.numpy as jnp
import numpy as np
from jax.experimental import pallas as pl
from jax.experimental.pallas import tpu as pltpu


# ----------------------------- helpers ---------------------------------------

def _round_up(n: int, m: int) -> int:
    return ((n + m - 1) // m) * m


# ----------------------------- fused kernel ----------------------------------

def _fused_mlp_kernel(alpha_ref, x_ref, *refs):
    """Fused MLP: y = W_L(...PReLU(W_1 x + b_1)...) + b_L.

    alpha_ref : SMEM (n_prelu,) f32   -- PReLU slopes (scalar path)
    x_ref     : VMEM (tb, Fin)        -- batch tile of inputs (UNPADDED lanes)
    refs      : (w0, b0, w1, b1, ..., o_ref); weights pre-transposed and
                zero-padded (fan_in of w0 to a multiple of 8, all fan_outs
                and later fan_ins to multiples of 128), biases (1, Fout_pad).
    """
    o_ref = refs[-1]
    wb_refs = refs[:-1]
    n_linear = len(wb_refs) // 2

    h = x_ref[...]
    # Zero-extend the feature dim in-register to match the (8-rounded)
    # fan_in of the first weight -- stays in vregs, no HBM traffic.
    fin = h.shape[1]
    fin8 = wb_refs[0].shape[0]
    if fin != fin8:
        h = jnp.concatenate(
            [h, jnp.zeros((h.shape[0], fin8 - fin), h.dtype)], axis=1)

    for i in range(n_linear):
        w = wb_refs[2 * i][...]
        b = wb_refs[2 * i + 1][...]          # (1, Fout_pad) -> broadcasts
        lhs = h if h.dtype == w.dtype else h.astype(w.dtype)
        h = jnp.dot(lhs, w, preferred_element_type=jnp.float32) + b
        if i < n_linear - 1:                 # PReLU on all hidden layers
            a = alpha_ref[i]                 # scalar read from SMEM
            h = jnp.where(h > 0.0, h, a * h)
    o_ref[...] = h.astype(o_ref.dtype)


# ----------------------------- wrapper ----------------------------------------

def agent_forward(params, x, batch_tile: int = 1024, slice_output: bool = True):
    """Forward pass of Agent via a single fused Pallas kernel."""
    B, fin = x.shape
    fout_p = params["w_pad"][-1].shape[1]
    n_out = params["w"][-1].shape[1]
    w_dtype = params["w_pad"][0].dtype

    # Stream activations in the weight dtype (bf16 halves the HBM read).
    act_dtype = w_dtype if w_dtype == jnp.bfloat16 else jnp.float32
    x = x.astype(act_dtype)

    # ---- batch tiling ---------------------------------------------------
    batch_tile = _round_up(max(int(batch_tile), 8), 8)   # multiple of 8
    Bp8 = _round_up(B, 8)
    if Bp8 <= 8:
        tb = Bp8                              # single tiny tile
    else:
        # keep >= 2 grid steps (v7x: 2 TensorCores), capped at batch_tile
        half = _round_up(pl.cdiv(Bp8, 2), 8)
        tb = min(batch_tile, half)
    num_tiles = pl.cdiv(Bp8, tb)
    Bp = num_tiles * tb

    if Bp != B:                               # pad ROWS only (no lane pad)
        x = jnp.pad(x, ((0, Bp - B), (0, 0)))

    # ---- specs / args ----------------------------------------------------
    in_specs = [pl.BlockSpec(memory_space=pltpu.MemorySpace.SMEM)]       # alphas
    in_specs.append(pl.BlockSpec((tb, fin), lambda i: (i, 0)))           # x tile
    args = [params["alphas"], x]
    for w_p, b_p in zip(params["w_pad"], params["b_pad"]):
        in_specs.append(pl.BlockSpec(w_p.shape, lambda i: (0, 0)))       # weight (resident)
        in_specs.append(pl.BlockSpec(b_p.shape, lambda i: (0, 0)))       # bias   (resident)
        args += [w_p, b_p]

    # ---- advisory cost + VMEM headroom ------------------------------------
    flops = 2 * Bp * sum(int(w.shape[0]) * int(w.shape[1])
                         for w in params["w_pad"])
    wb_bytes = sum(int(np.prod(w.shape)) * w.dtype.itemsize
                   + int(np.prod(b.shape)) * b.dtype.itemsize
                   for w, b in zip(params["w_pad"], params["b_pad"]))
    io_bytes = Bp * fin * x.dtype.itemsize + Bp * fout_p * 4
    cost = pl.CostEstimate(flops=flops, transcendentals=0,
                           bytes_accessed=io_bytes + wb_bytes)

    # double-buffered in/out tiles + resident params (+1 MiB slack); never
    # request less than the largest per-chip default (v5e's is only 16 MiB).
    est_vmem = (2 * tb * fin * x.dtype.itemsize
                + 2 * tb * fout_p * 4 + 2 * wb_bytes + (1 << 20))
    vmem_limit = int(min(64 << 20, max(32 << 20, 2 * est_vmem)))

    out_p = pl.pallas_call(
        _fused_mlp_kernel,
        out_shape=jax.ShapeDtypeStruct((Bp, fout_p), jnp.float32),
        grid=(num_tiles,),
        in_specs=in_specs,
        out_specs=pl.BlockSpec((tb, fout_p), lambda i: (i, 0)),
        compiler_params=pltpu.CompilerParams(
            dimension_semantics=("parallel",),
            vmem_limit_bytes=vmem_limit),
        cost_estimate=cost,
    )(*args)

    if slice_output:
        return out_p[:B, :n_out]
    return out_p          # padded (Bp, fout_p) buffer for fused consumers


# ----------------------------- parameter init ---------------------------------

def init_agent_params(layers, key, weight_dtype=jnp.float32):
    """PyTorch-default-style init.

    Linear: W, b ~ U(-1/sqrt(fan_in), 1/sqrt(fan_in)); PReLU alpha = 0.25.
    Stores both the logical (unpadded) params for the reference and the
    lane-padded, pre-transposed params for the kernel.  The first layer's
    fan_in is only rounded to a multiple of 8 (the input is streamed
    unpadded); all other contraction dims / fan_outs are 128-lane padded.
    bf16 weights are MXU-native on v5e/v6e/v7x (f32 accumulation kept; on
    v5e the PReLU/epilogue math stays f32 since its VPU has no bf16).
    """
    n = len(layers)
    n_linear = n - 1
    n_prelu = n - 2
    ws, bs, ws_pad, bs_pad = [], [], [], []
    for i in range(n_linear):
        fan_in, fan_out = layers[i], layers[i + 1]
        key, kw, kb = jax.random.split(key, 3)
        bound = 1.0 / (fan_in ** 0.5)
        # stored pre-transposed: (fan_in, fan_out)
        w = jax.random.uniform(kw, (fan_in, fan_out), jnp.float32,
                               -bound, bound).astype(weight_dtype)
        b = jax.random.uniform(kb, (fan_out,), jnp.float32, -bound, bound)

        fin_p = _round_up(fan_in, 8) if i == 0 else _round_up(fan_in, 128)
        fout_p = _round_up(fan_out, 128)
        w_p = jnp.zeros((fin_p, fout_p), weight_dtype).at[:fan_in, :fan_out].set(w)
        b_p = jnp.zeros((1, fout_p), jnp.float32).at[0, :fan_out].set(b)

        ws.append(w); bs.append(b); ws_pad.append(w_p); bs_pad.append(b_p)

    alphas = jnp.full((max(n_prelu, 1),), 0.25, jnp.float32)
    return {"w": ws, "b": bs, "w_pad": ws_pad, "b_pad": bs_pad, "alphas": alphas}


def agent_forward_ref(params, x):
    """Pure-JAX reference (uses the logical, unpadded parameters)."""
    h = x.astype(jnp.float32)
    n = len(params["w"])
    for i, (w, b) in enumerate(zip(params["w"], params["b"])):
        lhs = h if h.dtype == w.dtype else h.astype(w.dtype)
        h = jnp.dot(lhs, w, preferred_element_type=jnp.float32) + b
        if i < n - 1:
            h = jnp.where(h > 0.0, h, params["alphas"][i] * h)
    return h


# ----------------------------- main -------------------------------------------

if __name__ == "__main__":
    key = jax.random.PRNGKey(0)
    layers = [16, 32, 32, 4]   # state_dim=16, two hidden 32, n_actions=4
    batch = 8

    key, kx = jax.random.split(key)
    x = jax.random.normal(kx, (batch, layers[0]), jnp.float32)

    fwd = jax.jit(agent_forward, static_argnames=("batch_tile", "slice_output"))

    # f32 weights: exact-semantics check against the reference.
    params_f32 = init_agent_params(layers, key, weight_dtype=jnp.float32)
    out = jax.block_until_ready(fwd(params_f32, x))
    ref = agent_forward_ref(params_f32, x)
    assert out.shape == (batch, layers[-1])
    assert jnp.allclose(out, ref, atol=1e-5, rtol=1e-5), "f32 mismatch vs reference"

    # bf16 weights (MXU-native), bf16 input stream, f32 accumulation.
    params_bf16 = init_agent_params(layers, key, weight_dtype=jnp.bfloat16)
    out16 = jax.block_until_ready(fwd(params_bf16, x))
    ref16 = agent_forward_ref(params_bf16, x.astype(jnp.bfloat16))
    assert jnp.allclose(out16, ref16, atol=1e-2, rtol=1e-2), "bf16 mismatch vs reference"

    # Larger, multi-tile batch (exercises the "parallel" grid path).
    key, kx2 = jax.random.split(key)
    x_big = jax.random.normal(kx2, (100, layers[0]), jnp.float32)
    out_big = jax.block_until_ready(fwd(params_f32, x_big, batch_tile=1024))
    ref_big = agent_forward_ref(params_f32, x_big)
    assert out_big.shape == (100, layers[-1])
    assert jnp.allclose(out_big, ref_big, atol=1e-5, rtol=1e-5), "multi-tile mismatch"

    print("KERNEL_OK")
</pallas_src>

<mosaic_0001>
module attributes {stable_mosaic.version = 11 : i64} {
  func.func @_fused_mlp_kernel(%arg0: i32, %arg1: memref<2xf32, #tpu.memory_space<smem>>, %arg2: memref<8x16xf32, #tpu.memory_space<vmem>>, %arg3: memref<16x128xf32, #tpu.memory_space<vmem>>, %arg4: memref<1x128xf32, #tpu.memory_space<vmem>>, %arg5: memref<128x128xf32, #tpu.memory_space<vmem>>, %arg6: memref<1x128xf32, #tpu.memory_space<vmem>>, %arg7: memref<128x128xf32, #tpu.memory_space<vmem>>, %arg8: memref<1x128xf32, #tpu.memory_space<vmem>>, %arg9: memref<8x128xf32, #tpu.memory_space<vmem>>) attributes {dimension_semantics = [#tpu.dimension_semantics<parallel>], iteration_bounds = array<i64: 1>, scalar_prefetch = 0 : i64, scratch_operands = 0 : i64, tpu.core_type = #tpu.core_type<tc>, window_params = [{transform_indices = @transform_0, window_bounds = array<i64: 2>}, {transform_indices = @transform_1, window_bounds = array<i64: 8, 16>}, {pipeline_mode = #tpu.pipeline_mode<synchronous>, transform_indices = @transform_2, window_bounds = array<i64: 16, 128>}, {pipeline_mode = #tpu.pipeline_mode<synchronous>, transform_indices = @transform_3, window_bounds = array<i64: 1, 128>}, {pipeline_mode = #tpu.pipeline_mode<synchronous>, transform_indices = @transform_4, window_bounds = array<i64: 128, 128>}, {pipeline_mode = #tpu.pipeline_mode<synchronous>, transform_indices = @transform_5, window_bounds = array<i64: 1, 128>}, {pipeline_mode = #tpu.pipeline_mode<synchronous>, transform_indices = @transform_6, window_bounds = array<i64: 128, 128>}, {pipeline_mode = #tpu.pipeline_mode<synchronous>, transform_indices = @transform_7, window_bounds = array<i64: 1, 128>}, {transform_indices = @transform_8, window_bounds = array<i64: 8, 128>}]} {
    %c0 = arith.constant 0 : index
    %c0_0 = arith.constant 0 : index
    %0 = vector.load %arg2[%c0, %c0_0] : memref<8x16xf32, #tpu.memory_space<vmem>>, vector<8x16xf32>
    %c0_1 = arith.constant 0 : index
    %c0_2 = arith.constant 0 : index
    %1 = vector.load %arg3[%c0_1, %c0_2] : memref<16x128xf32, #tpu.memory_space<vmem>>, vector<16x128xf32>
    %c0_3 = arith.constant 0 : index
    %c0_4 = arith.constant 0 : index
    %2 = vector.load %arg4[%c0_3, %c0_4] : memref<1x128xf32, #tpu.memory_space<vmem>>, vector<1x128xf32>
    %cst = arith.constant dense<0.000000e+00> : vector<8x128xf32>
    %3 = tpu.matmul %0, %1, %cst {dimension_numbers = #tpu.dot_dimension_numbers<[1], [0], [0], [1], [0, 0, 1, 1], [], []>} : vector<8x16xf32>, vector<16x128xf32>, vector<8x128xf32> -> vector<8x128xf32>
    %4 = vector.broadcast %2 : vector<1x128xf32> to vector<8x128xf32>
    %5 = arith.addf %3, %4 : vector<8x128xf32>
    %c0_5 = arith.constant 0 : index
    %6 = memref.load %arg1[%c0_5] : memref<2xf32, #tpu.memory_space<smem>>
    %cst_6 = arith.constant 0.000000e+00 : f32
    %7 = vector.broadcast %cst_6 : f32 to vector<8x128xf32>
    %8 = arith.cmpf ogt, %5, %7 : vector<8x128xf32>
    %9 = vector.broadcast %6 : f32 to vector<8x128xf32>
    %10 = arith.mulf %9, %5 : vector<8x128xf32>
    %11 = arith.select %8, %5, %10 : vector<8x128xi1>, vector<8x128xf32>
    %c0_7 = arith.constant 0 : index
    %c0_8 = arith.constant 0 : index
    %12 = vector.load %arg5[%c0_7, %c0_8] : memref<128x128xf32, #tpu.memory_space<vmem>>, vector<128x128xf32>
    %c0_9 = arith.constant 0 : index
    %c0_10 = arith.constant 0 : index
    %13 = vector.load %arg6[%c0_9, %c0_10] : memref<1x128xf32, #tpu.memory_space<vmem>>, vector<1x128xf32>
    %cst_11 = arith.constant dense<0.000000e+00> : vector<8x128xf32>
    %14 = tpu.matmul %11, %12, %cst_11 {dimension_numbers = #tpu.dot_dimension_numbers<[1], [0], [0], [1], [0, 0, 1, 1], [], []>} : vector<8x128xf32>, vector<128x128xf32>, vector<8x128xf32> -> vector<8x128xf32>
    %15 = vector.broadcast %13 : vector<1x128xf32> to vector<8x128xf32>
    %16 = arith.addf %14, %15 : vector<8x128xf32>
    %c1 = arith.constant 1 : index
    %17 = memref.load %arg1[%c1] : memref<2xf32, #tpu.memory_space<smem>>
    %cst_12 = arith.constant 0.000000e+00 : f32
    %18 = vector.broadcast %cst_12 : f32 to vector<8x128xf32>
    %19 = arith.cmpf ogt, %16, %18 : vector<8x128xf32>
    %20 = vector.broadcast %17 : f32 to vector<8x128xf32>
    %21 = arith.mulf %20, %16 : vector<8x128xf32>
    %22 = arith.select %19, %16, %21 : vector<8x128xi1>, vector<8x128xf32>
    %c0_13 = arith.constant 0 : index
    %c0_14 = arith.constant 0 : index
    %23 = vector.load %arg7[%c0_13, %c0_14] : memref<128x128xf32, #tpu.memory_space<vmem>>, vector<128x128xf32>
    %c0_15 = arith.constant 0 : index
    %c0_16 = arith.constant 0 : index
    %24 = vector.load %arg8[%c0_15, %c0_16] : memref<1x128xf32, #tpu.memory_space<vmem>>, vector<1x128xf32>
    %cst_17 = arith.constant dense<0.000000e+00> : vector<8x128xf32>
    %25 = tpu.matmul %22, %23, %cst_17 {dimension_numbers = #tpu.dot_dimension_numbers<[1], [0], [0], [1], [0, 0, 1, 1], [], []>} : vector<8x128xf32>, vector<128x128xf32>, vector<8x128xf32> -> vector<8x128xf32>
    %26 = vector.broadcast %24 : vector<1x128xf32> to vector<8x128xf32>
    %27 = arith.addf %25, %26 : vector<8x128xf32>
    %c0_18 = arith.constant 0 : index
    %c0_19 = arith.constant 0 : index
    %28 = vector.load %arg9[%c0_18, %c0_19] : memref<8x128xf32, #tpu.memory_space<vmem>>, vector<8x128xf32>
    tpu.vector_store %arg9[%c0_18, %c0_19], %27 {strides = array<i32>} : memref<8x128xf32, #tpu.memory_space<vmem>>, vector<8x128xf32>,
    return
  }
  func.func @transform_0(%arg0: i32) -> i32 {
    %c0_i32 = arith.constant 0 : i32
    %c0_i32_0 = arith.constant 0 : i32
    return %c0_i32 : i32
  }
  func.func @transform_1(%arg0: i32) -> (i32, i32) {
    %c0_i32 = arith.constant 0 : i32
    %c0_i32_0 = arith.constant 0 : i32
    return %arg0, %c0_i32 : i32, i32
  }
  func.func @transform_2(%arg0: i32) -> (i32, i32) {
    %c0_i32 = arith.constant 0 : i32
    %c0_i32_0 = arith.constant 0 : i32
    %c0_i32_1 = arith.constant 0 : i32
    return %c0_i32, %c0_i32_0 : i32, i32
  }
  func.func @transform_3(%arg0: i32) -> (i32, i32) {
    %c0_i32 = arith.constant 0 : i32
    %c0_i32_0 = arith.constant 0 : i32
    %c0_i32_1 = arith.constant 0 : i32
    return %c0_i32, %c0_i32_0 : i32, i32
  }
  func.func @transform_4(%arg0: i32) -> (i32, i32) {
    %c0_i32 = arith.constant 0 : i32
    %c0_i32_0 = arith.constant 0 : i32
    %c0_i32_1 = arith.constant 0 : i32
    return %c0_i32, %c0_i32_0 : i32, i32
  }
  func.func @transform_5(%arg0: i32) -> (i32, i32) {
    %c0_i32 = arith.constant 0 : i32
    %c0_i32_0 = arith.constant 0 : i32
    %c0_i32_1 = arith.constant 0 : i32
    return %c0_i32, %c0_i32_0 : i32, i32
  }
  func.func @transform_6(%arg0: i32) -> (i32, i32) {
    %c0_i32 = arith.constant 0 : i32
    %c0_i32_0 = arith.constant 0 : i32
    %c0_i32_1 = arith.constant 0 : i32
    return %c0_i32, %c0_i32_0 : i32, i32
  }
  func.func @transform_7(%arg0: i32) -> (i32, i32) {
    %c0_i32 = arith.constant 0 : i32
    %c0_i32_0 = arith.constant 0 : i32
    %c0_i32_1 = arith.constant 0 : i32
    return %c0_i32, %c0_i32_0 : i32, i32
  }
  func.func @transform_8(%arg0: i32) -> (i32, i32) {
    %c0_i32 = arith.constant 0 : i32
    %c0_i32_0 = arith.constant 0 : i32
    return %arg0, %c0_i32 : i32, i32
  }
}

</mosaic_0001>

<bundles_post_ra>
// kernel: agent_forward.1
= control target key start
LH: loop header
LB: loop body
LE: loop exit
PB: predicated region body
PF: predicated region fallthrough
CT: control target
= control target key end

     0   :  { %13 = vsyncpa [#allocation4], 0  ;;  %s488_s0 = inlined_call_operand.hbm [shape: f32[2], index: 0, kind: input, shape index: {}]   ;;  %s489_s1 = inlined_call_operand.hbm [shape: f32[8,16], index: 1, kind: input, shape index: {}]   ;;  %s490_s2 = inlined_call_operand.hbm [shape: f32[16,128], index: 2, kind: input, shape index: {}]   ;;  %s491_s3 = inlined_call_operand.hbm [shape: f32[1,128], index: 3, kind: input, shape index: {}]   ;;  %s492_s4 = inlined_call_operand.hbm [shape: f32[128,128], index: 4, kind: input, shape index: {}]   ;;  %s493_s5 = inlined_call_operand.vmem [shape: f32[1,128], index: 5, kind: input, shape index: {}]   ;;  %s494_s6 = inlined_call_operand.hbm [shape: f32[128,128], index: 6, kind: input, shape index: {}]   ;;  %s495_s7 = inlined_call_operand.vmem [shape: f32[1,128], index: 7, kind: input, shape index: {}]   ;;  %s496_s8 = inlined_call_operand.vmem [shape: f32[8,128], index: 8, kind: output, shape index: {}]  }
   0x1   :  { %14 = vsyncpa [#allocation3], 0 }
   0x2   :  { %15 = vsyncpa [#allocation7], 0  ;;  %s41_s29 = sshll.u32 %s490_s2, 4  ;;  %s42_s29 = int_to_ptr.hbm [resolvable:$true] %s41_s29 }
   0x3   :  { %16 = vsyncpa [#allocation10], 0  ;;  %s399_s30 = smov [#allocation6]   ;;  %s65_s12 = sshll.u32 %s492_s4, 4  ;;  %s66_s12 = int_to_ptr.hbm [resolvable:$true] %s65_s12 }
   0x4   :  { %s43_s9 = sshll.u32 %s399_s30, 4  ;;  %s400_s13 = smov 128   ;;  %s44_s9 = int_to_ptr.vmem [resolvable:$true] %s43_s9 }
   0x5   :  { %s401_s14 = smov 8   ;;  %s402_s15 = smov [#allocation9]  }
   0x6   :  { %49 = dma.hbm_to_vmem [thread:$0]  %s42_s29, 256, %s44_s9, [#allocation7], %s400_s13, %s400_s13, %s401_s14  }
   0x7   :  { %s67_s16 = sshll.u32 %s402_s15, 4  ;;  %s22_s18 = sshll.u32 %s488_s0, 4  ;;  %s68_s16 = int_to_ptr.vmem [resolvable:$true] %s67_s16  ;;  %s23_s18 = int_to_ptr.hbm [resolvable:$true] %s22_s18 }
   0x8   :  { %73 = dma.hbm_to_vmem [thread:$0]  %s66_s12, 2048, %s68_s16, [#allocation10], %s400_s13, %s400_s13, %s401_s14  }
   0x9   :  { %s31_s20 = sshll.u32 %s489_s1, 4  ;;  %s403_s21 = smov [#allocation2]   ;;  %s32_s20 = int_to_ptr.hbm [resolvable:$true] %s31_s20 }
   0xa   :  { %25 = dma.hbm_to_smem %s23_s18, 16, %s403_s21, [#allocation4]  }
   0xb   :  { %s404_s22 = smov [#allocation5]   ;;  %s55_s26 = sshll.u32 %s491_s3, 4  ;;  %s56_s26 = int_to_ptr.hbm [resolvable:$true] %s55_s26 }
   0xc   :  { %s33_s23 = sshll.u32 %s404_s22, 4  ;;  %s80_s28 = sshll.u32 %s494_s6, 4  ;;  %s34_s23 = int_to_ptr.vmem [resolvable:$true] %s33_s23  ;;  %s81_s28 = int_to_ptr.hbm [resolvable:$true] %s80_s28 }
   0xd   :  { %36 = dma.hbm_to_vmem [thread:$0]  %s32_s20, 128, %s34_s23, [#allocation3]  }
   0xe   :  { %s405_s29 = smov [#allocation8]   ;;  %s406_s1 = smov [#allocation11]  }
   0xf   :  { %s57_s30 = sshll.u32 %s405_s29, 4  ;;  %s82_s9 = sshll.u32 %s406_s1, 4  ;;  %s58_s30 = int_to_ptr.vmem [resolvable:$true] %s57_s30  ;;  %s83_s9 = int_to_ptr.vmem [resolvable:$true] %s82_s9 }
  0x10   :  { %60 = dma.hbm_to_vmem [thread:$0]  %s56_s26, 16, %s58_s30, [#allocation7]  }
  0x11   :  { %88 = dma.hbm_to_vmem [thread:$0]  %s81_s28, 2048, %s83_s9, [#allocation10], %s400_s13, %s400_s13, %s401_s14  }
  0x12   :  { %391 = dma.done.wait [#allocation4], 16  }
  0x13   :  { %392 = vsyncadd [#allocation4], 4294967280 }
  0x14   :  { %393 = dma.done.wait [#allocation3], 128  }
  0x15   :  { %394 = vsyncadd [#allocation3], 4294967168 }
  0x16   :  { %395 = dma.done.wait [#allocation7], 272  }
  0x17   :  { %396 = vsyncadd [#allocation7], 4294967024 }
  0x18   :  { %397 = dma.done.wait [#allocation10], 4096  }
  0x19   :  { %398 = vsyncadd [#allocation10], 4294963200 }
  0x1a   :  { %115 = sfence }
  0x1b   :  { %v118_v0 = vld [vmem:[#allocation6 + $0x8] sm:$0xff]  ;;  %v117_v1 = vld [vmem:[#allocation6] sm:$0xff]  ;;  %v116_v2 = vld [vmem:[#allocation5] sm:$0xff]  ;;  %vm123_vm0 = vcmask 130048   ;;  %s147_s3 = sld [smem:[#allocation2]] }
  0x1c   :  { %141 = vmatpush.msra.mxu0 %v118_v0  ;;  %v167_v3 = vld [vmem:[#allocation9 + $0x78] sm:$0xff]  ;;  %v166_v4 = vld [vmem:[#allocation9 + $0x70] sm:$0xff]  ;;  %v165_v5 = vld [vmem:[#allocation9 + $0x68] sm:$0xff]  ;;  %s247_s6 = sld [smem:[#allocation2 + $0x1]] }
  0x1d   :  { %172 = vmatpush.msra.mxu1 %v167_v3  ;;  %v164_v6 = vld [vmem:[#allocation9 + $0x60] sm:$0xff]  ;;  %v163_v7 = vld [vmem:[#allocation9 + $0x58] sm:$0xff]  ;;  %v162_v8 = vld [vmem:[#allocation9 + $0x50] sm:$0xff] }
  0x1e   :  { %142 = vmatpush.msra.mxu0 %v117_v1  ;;  %v161_v9 = vld [vmem:[#allocation9 + $0x48] sm:$0xff]  ;;  %v160_v10 = vld [vmem:[#allocation9 + $0x40] sm:$0xff]  ;;  %v159_v11 = vld [vmem:[#allocation9 + $0x38] sm:$0xff] }
  0x1f   :  { %246 = vmatmul.msk.f32.vlgmr.msra.gmra.mxu0 %vm123_vm0, %v116_v2  ;;  %173 = vmatpush.msra.mxu1 %v166_v4  ;;  %v158_v12 = vld [vmem:[#allocation9 + $0x30] sm:$0xff]  ;;  %v157_v13 = vld [vmem:[#allocation9 + $0x28] sm:$0xff]  ;;  %v156_v14 = vld [vmem:[#allocation9 + $0x20] sm:$0xff] }
  0x20   :  { %v155_v15 = vld [vmem:[#allocation9 + $0x18] sm:$0xff]  ;;  %v154_v16 = vld [vmem:[#allocation9 + $0x10] sm:$0xff]  ;;  %v153_v17 = vld [vmem:[#allocation9 + $0x8] sm:$0xff] }
  0x21   :  { %174 = vmatpush.msra.mxu1 %v165_v5  ;;  %v152_v18 = vld [vmem:[#allocation9] sm:$0xff]  ;;  %v212_v19 = vld [vmem:[#allocation11 + $0x78] sm:$0xff]  ;;  %v211_v20 = vld [vmem:[#allocation11 + $0x70] sm:$0xff]  ;;  %v149_v34 = vstv %s147_s3 }
  0x22   :  { %217 = vmatpush.msra.mxu2 %v212_v19  ;;  %v210_v21 = vld [vmem:[#allocation11 + $0x68] sm:$0xff]  ;;  %v209_v22 = vld [vmem:[#allocation11 + $0x60] sm:$0xff]  ;;  %v208_v23 = vld [vmem:[#allocation11 + $0x58] sm:$0xff]  ;;  %v194_v43 = vstv %s247_s6 }
  0x23   :  { %175 = vmatpush.msra.mxu1 %v164_v6  ;;  %v207_v24 = vld [vmem:[#allocation11 + $0x50] sm:$0xff]  ;;  %v206_v25 = vld [vmem:[#allocation11 + $0x48] sm:$0xff]  ;;  %v205_v26 = vld [vmem:[#allocation11 + $0x40] sm:$0xff] }
  0x24   :  { %218 = vmatpush.msra.mxu2 %v211_v20  ;;  %v204_v27 = vld [vmem:[#allocation11 + $0x38] sm:$0xff]  ;;  %v203_v28 = vld [vmem:[#allocation11 + $0x30] sm:$0xff]  ;;  %v202_v29 = vld [vmem:[#allocation11 + $0x28] sm:$0xff] }
  0x25   :  { %176 = vmatpush.msra.mxu1 %v163_v7  ;;  %v201_v30 = vld [vmem:[#allocation11 + $0x20] sm:$0xff]  ;;  %v200_v31 = vld [vmem:[#allocation11 + $0x18] sm:$0xff]  ;;  %v199_v38 = vld [vmem:[#allocation11 + $0x10] sm:$0xff] }
  0x26   :  { %219 = vmatpush.msra.mxu2 %v210_v21  ;;  %v256_v32 = vld [vmem:[#allocation8] ss:$0 sm:$0xff]  ;;  %v198_v39 = vld [vmem:[#allocation11 + $0x8] sm:$0xff]  ;;  %v197_v40 = vld [vmem:[#allocation11] sm:$0xff] }
  0x27   :  { %177 = vmatpush.msra.mxu1 %v162_v8  ;;  %v257_v41 = vld [vmem:[%s493_s5] ss:$0 sm:$0xff] }
  0x28   :  { %220 = vmatpush.msra.mxu2 %v209_v22  ;;  %v258_v47 = vld [vmem:[%s495_s7] ss:$0 sm:$0xff] }
  0x29   :  { %178 = vmatpush.msra.mxu1 %v161_v9 }
  0x2a   :  { %221 = vmatpush.msra.mxu2 %v208_v23 }
  0x2b   :  { %179 = vmatpush.msra.mxu1 %v160_v10 }
  0x2c   :  { %222 = vmatpush.msra.mxu2 %v207_v24 }
  0x2d   :  { %180 = vmatpush.msra.mxu1 %v159_v11 }
  0x2e   :  { %223 = vmatpush.msra.mxu2 %v206_v25 }
  0x2f   :  { %181 = vmatpush.msra.mxu1 %v158_v12 }
  0x30   :  { %224 = vmatpush.msra.mxu2 %v205_v26 }
  0x31   :  { %182 = vmatpush.msra.mxu1 %v157_v13 }
  0x32   :  { %225 = vmatpush.msra.mxu2 %v204_v27 }
  0x33   :  { %183 = vmatpush.msra.mxu1 %v156_v14 }
  0x34   :  { %226 = vmatpush.msra.mxu2 %v203_v28 }
  0x35   :  { %184 = vmatpush.msra.mxu1 %v155_v15 }
  0x36   :  { %227 = vmatpush.msra.mxu2 %v202_v29 }
  0x37   :  { %185 = vmatpush.msra.mxu1 %v154_v16 }
  0x38   :  { %228 = vmatpush.msra.mxu2 %v201_v30 }
  0x39   :  { %186 = vmatpush.msra.mxu1 %v153_v17 }
  0x3a   :  { %229 = vmatpush.msra.mxu2 %v200_v31 }
  0x3b   :  { %187 = vmatpush.msra.mxu1 %v152_v18 }
  0x3c   :  { %230 = vmatpush.msra.mxu2 %v199_v38 }
  0x3e   :  { %231 = vmatpush.msra.mxu2 %v198_v39 }
  0x40   :  { %232 = vmatpush.msra.mxu2 %v197_v40 }
  0x9c   :  { %v144_v33 = vpop.f32.mrf.mxu0 }
  0x9d   :  { %v145_v35 = vadd.f32 %v256_v32, %v144_v33 }
  0x9f   :  { %vm148_vm1 = vcmp.gt.f32.partialorder %v145_v35, 0.0  ;;  %v150_v36 = vmul.f32 %v149_v34, %v145_v35 }
  0xa1   :  { %v151_v37 = vsel %vm148_vm1, %v145_v35, %v150_v36 }
  0xa2   :  { %188 = vmatmul.f32.vlgmr.msra.gmra.mxu1 %v151_v37 }
 0x11f   :  { %v189_v42 = vpop.f32.mrf.mxu1 }
 0x120   :  { %v190_v44 = vadd.f32 %v257_v41, %v189_v42 }
 0x122   :  { %vm193_vm2 = vcmp.gt.f32.partialorder %v190_v44, 0.0  ;;  %v195_v45 = vmul.f32 %v194_v43, %v190_v44 }
 0x124   :  { %v196_v46 = vsel %vm193_vm2, %v190_v44, %v195_v45 }
 0x125   :  { %233 = vmatmul.f32.vlgmr.msra.gmra.mxu2 %v196_v46 }
 0x1a8   :  { %v234_v48 = vpop.f32.mrf.mxu2 }
 0x1a9   :  { %v235_v49 = vadd.f32 %v258_v47, %v234_v48 }
 0x1ab   :  { %237 = vst [vmem:[%s496_s8] sm:$0xff] %v235_v49 }
 0x1ac   :  { %242 = vsyncpa [#allocation3], 1 }
 0x1ad   :  { %243 = vsyncpa [#allocation7], 1 }
 0x1ae   :  { %244 = vsyncpa [#allocation10], 1 }
 0x1af   :  { %245 = vsyncpa [#allocation4], 1 }

</bundles_post_ra>
